<compile_context>
chip_gen: v6e
topology: v6e:2x2x1
jax: 0.10.0
libtpu: 0.0.40
codegen_flags: <defaults>
</compile_context>

<pallas_src>
import functools
import math

import jax
import jax.numpy as jnp
from jax import lax
from jax.experimental import pallas as pl
from jax.experimental.pallas import tpu as pltpu

HIDDEN = 64
NUM_CLASSES = 3
LANE = 128
SUBLANE = 8


def _round_up(a, b):
    return (a + b - 1) // b * b


# --------------------------------------------------------------------------
# Pallas kernels
# --------------------------------------------------------------------------
def gcn_main_kernel(a_ref, x_ref, pa_ref, w1_ref, b1_ref, w2_ref,
                    part_ref, agg_ref, *, tile_k, x_resident):
    """Grid = (row tiles i [parallel], reduction tiles k over A_hat cols [arbitrary]).

    every (i, k):  agg      += A_hat[i, k] @ X[k]          (bf16 MXU, f32 acc)
    k == last:     h         = relu(agg @ W1 + b1)
                   part[i]   = (P @ A_hat)[:, i] @ (h @ W2)  (mean-pool folded in)

    b2 / sum-over-i / log_softmax happen in a tiny second kernel so that the i
    axis carries no cross-iteration state and can be split across TensorCores.
    """
    k = pl.program_id(1)
    nk = pl.num_programs(1)

    @pl.when(k == 0)
    def _init_agg():
        agg_ref[...] = jnp.zeros_like(agg_ref)

    if x_resident:
        start = pl.multiple_of(k * tile_k, tile_k)
        x_tile = x_ref[pl.ds(start, tile_k), :]
    else:
        x_tile = x_ref[...]
    agg_ref[...] += jnp.dot(a_ref[...], x_tile,
                            preferred_element_type=jnp.float32)

    @pl.when(k == nk - 1)
    def _row_tile_epilogue():
        # conv1: (A_hat @ X) @ W1 + b1, ReLU   (bf16 operands, f32 accumulate)
        h = jnp.dot(agg_ref[...].astype(jnp.bfloat16), w1_ref[...],
                    preferred_element_type=jnp.float32) + b1_ref[...]
        h = jnp.maximum(h, 0.0).astype(jnp.bfloat16)
        # conv2 with mean-pool folded in.
        # NOTE: padded node rows have h = relu(b1) != 0; correctness relies on
        # PA's padded columns being exactly zero (enforced in the wrapper).
        hw = jnp.dot(h, w2_ref[...], preferred_element_type=jnp.float32)
        part_ref[...] = jnp.dot(pa_ref[...], hw.astype(jnp.bfloat16),
                                preferred_element_type=jnp.float32)


def gcn_finalize_kernel(part_ref, b2_ref, o_ref, *, num_classes):
    """Sum per-row-tile partial pooled logits, add b2, masked log_softmax."""
    logits = jnp.sum(part_ref[...], axis=0) + b2_ref[...]      # [G_pad, C_pad]
    col = lax.broadcasted_iota(jnp.int32, logits.shape, 1)
    valid = col < num_classes                                   # mask padded classes
    masked = jnp.where(valid, logits, -1e30)
    m = jnp.max(masked, axis=1, keepdims=True)
    z = logits - m
    e = jnp.where(valid, jnp.exp(z), 0.0)
    lse = jnp.log(jnp.sum(e, axis=1, keepdims=True))
    o_ref[...] = z - lse


# --------------------------------------------------------------------------
# Wrapper: graph preprocessing (plain JAX) + tiled pallas_calls
# --------------------------------------------------------------------------
def gcn_forward(x, edge_index, batch, params, num_graphs, *,
                tile_m=256, tile_k=2048):
    n, f_in = x.shape
    w1, b1, w2, b2 = params
    hidden = w1.shape[1]
    num_classes = w2.shape[1]

    # Padded, lane-dense sizes.  Rows are padded at tile_m granularity; the
    # contraction tile is clamped so it always divides n_pad.
    n_pad = _round_up(max(n, tile_m), tile_m)
    tile_k = math.gcd(n_pad, max(tile_k, tile_m))
    f_pad = LANE
    c_pad = LANE
    g_pad = _round_up(max(num_graphs, SUBLANE), SUBLANE)

    # ---- graph preprocessing (single sparse pass, no dense f32 A_hat) ------
    # A_hat = D^{-1/2}(A + I)D^{-1/2}, torch_geometric convention A[dst,src]+=1.
    # TODO(synk): for large sparse graphs replace the dense O(N^2) adjacency
    # with a CSR gather path (scalar-prefetch row offsets + manual DMA).
    src, dst = edge_index[0], edge_index[1]
    deg = jnp.ones((n,), jnp.float32).at[dst].add(1.0)          # includes self loop
    d_inv_sqrt = lax.rsqrt(deg)
    a_hat_p = jnp.zeros((n_pad, n_pad), jnp.bfloat16)
    a_hat_p = a_hat_p.at[dst, src].add(
        (d_inv_sqrt[dst] * d_inv_sqrt[src]).astype(jnp.bfloat16))
    a_hat_p = a_hat_p.at[jnp.arange(n), jnp.arange(n)].add(
        (d_inv_sqrt * d_inv_sqrt).astype(jnp.bfloat16))

    # PA = mean_pool @ A_hat from edge-wise segment sums (O(E+N)); assumes (as
    # in a torch_geometric Batch) that edges never cross graphs.
    counts = jnp.zeros((num_graphs,), jnp.float32).at[batch].add(1.0)
    counts = jnp.maximum(counts, 1.0)
    colsum = d_inv_sqrt + jnp.zeros((n,), jnp.float32).at[src].add(d_inv_sqrt[dst])
    pa_vals = d_inv_sqrt * colsum / counts[batch]
    # Padded columns (nodes >= n) and rows (graphs >= num_graphs) stay exactly
    # zero: this makes the non-zero h of padded node rows harmless.
    pa_p = jnp.zeros((g_pad, n_pad), jnp.bfloat16).at[batch, jnp.arange(n)].set(
        pa_vals.astype(jnp.bfloat16))

    x_p = jnp.zeros((n_pad, f_pad), jnp.bfloat16).at[:n, :f_in].set(
        x.astype(jnp.bfloat16))
    w1_p = jnp.zeros((f_pad, hidden), jnp.bfloat16).at[:f_in, :].set(
        w1.astype(jnp.bfloat16))
    b1_p = b1.reshape(1, hidden).astype(jnp.float32)
    w2_p = jnp.zeros((hidden, c_pad), jnp.bfloat16).at[:, :num_classes].set(
        w2.astype(jnp.bfloat16))
    b2_p = jnp.zeros((1, c_pad), jnp.float32).at[:, :num_classes].set(b2)

    ni = n_pad // tile_m
    nk = n_pad // tile_k

    # X is kept fully resident in VMEM unless too large (keep 2x A-tile +
    # 2x X + scratch comfortably inside the v7x 32 MiB scoped budget).
    x_resident = (2 * n_pad * f_pad * 2) <= (8 << 20)
    if x_resident:
        x_spec = pl.BlockSpec((n_pad, f_pad), lambda i, k: (0, 0))
    else:
        x_spec = pl.BlockSpec((tile_k, f_pad), lambda i, k: (k, 0))

    grid_spec = pltpu.PrefetchScalarGridSpec(
        num_scalar_prefetch=0,
        grid=(ni, nk),
        in_specs=[
            pl.BlockSpec((tile_m, tile_k), lambda i, k: (i, k)),   # A_hat (bf16)
            x_spec,                                                # X (bf16)
            pl.BlockSpec((g_pad, tile_m), lambda i, k: (0, i)),    # PA cols (bf16)
            pl.BlockSpec((f_pad, hidden), lambda i, k: (0, 0)),    # W1 (bf16)
            pl.BlockSpec((1, hidden), lambda i, k: (0, 0)),        # b1 (f32)
            pl.BlockSpec((hidden, c_pad), lambda i, k: (0, 0)),    # W2 (bf16)
        ],
        out_specs=pl.BlockSpec((None, g_pad, c_pad), lambda i, k: (i, 0, 0)),
        scratch_shapes=[
            pltpu.VMEM((tile_m, f_pad), jnp.float32),              # agg accumulator
        ],
    )

    flops = (2 * n_pad * n_pad * f_pad          # A_hat @ X
             + 2 * n_pad * f_pad * hidden       # (.) @ W1
             + 2 * n_pad * hidden * c_pad       # h @ W2
             + 2 * g_pad * n_pad * c_pad)       # PA @ (.)
    x_bytes = x_p.size * 2 if x_resident else ni * x_p.size * 2
    bytes_accessed = (a_hat_p.size * 2 + x_bytes + pa_p.size * 2
                      + w1_p.size * 2 + w2_p.size * 2
                      + b1_p.size * 4 + ni * g_pad * c_pad * 4)

    partials = pl.pallas_call(
        functools.partial(gcn_main_kernel, tile_k=tile_k, x_resident=x_resident),
        out_shape=jax.ShapeDtypeStruct((ni, g_pad, c_pad), jnp.float32),
        grid_spec=grid_spec,
        compiler_params=pltpu.CompilerParams(
            # i carries no cross-iteration state -> parallel (megacore on v7x);
            # k feeds the resident agg accumulator -> arbitrary (and is last).
            dimension_semantics=("parallel", "arbitrary"),
            vmem_limit_bytes=32 * 1024 * 1024,
        ),
        cost_estimate=pl.CostEstimate(
            flops=flops, transcendentals=0, bytes_accessed=bytes_accessed),
    )(a_hat_p, x_p, pa_p, w1_p, b1_p, w2_p)

    # Tiny epilogue kernel: sum row-tile partials, add b2, masked log_softmax.
    out = pl.pallas_call(
        functools.partial(gcn_finalize_kernel, num_classes=num_classes),
        out_shape=jax.ShapeDtypeStruct((g_pad, c_pad), jnp.float32),
        grid=(1,),
        in_specs=[
            pl.BlockSpec((ni, g_pad, c_pad), lambda i: (0, 0, 0)),
            pl.BlockSpec((1, c_pad), lambda i: (0, 0)),
        ],
        out_specs=pl.BlockSpec((g_pad, c_pad), lambda i: (0, 0)),
        compiler_params=pltpu.CompilerParams(
            dimension_semantics=("arbitrary",)),
    )(partials, b2_p)

    return out[:num_graphs, :num_classes]


# --------------------------------------------------------------------------
# Parameter init + pure-JAX reference + demo
# --------------------------------------------------------------------------
def init_params(key):
    k1, k2 = jax.random.split(key)
    w1 = jax.random.normal(k1, (2, HIDDEN), jnp.float32) * (1.0 / jnp.sqrt(2.0))
    b1 = jnp.zeros((HIDDEN,), jnp.float32)
    w2 = jax.random.normal(k2, (HIDDEN, NUM_CLASSES), jnp.float32) * (1.0 / jnp.sqrt(64.0))
    b2 = jnp.zeros((NUM_CLASSES,), jnp.float32)
    return (w1, b1, w2, b2)


def gcn_reference(x, edge_index, batch, params, num_graphs):
    """Pure-JAX f32 reference matching the PyTorch module."""
    w1, b1, w2, b2 = params
    n = x.shape[0]
    src, dst = edge_index[0], edge_index[1]
    adj = jnp.zeros((n, n), jnp.float32).at[dst, src].add(1.0)
    adj = adj + jnp.eye(n, dtype=jnp.float32)
    deg = jnp.sum(adj, axis=1)
    dis = jnp.where(deg > 0, 1.0 / jnp.sqrt(deg), 0.0)
    a_hat = dis[:, None] * adj * dis[None, :]
    h = jnp.maximum(a_hat @ (x @ w1) + b1, 0.0)
    h = a_hat @ (h @ w2) + b2
    onehot = (batch[None, :] == jnp.arange(num_graphs)[:, None]).astype(jnp.float32)
    pool = onehot / jnp.maximum(jnp.sum(onehot, axis=1, keepdims=True), 1.0)
    pooled = pool @ h
    return jax.nn.log_softmax(pooled, axis=1)


if __name__ == "__main__":
    key = jax.random.PRNGKey(0)
    kx, kp = jax.random.split(key)

    # 2 graphs x 8 nodes each, ring topology (undirected -> both directions).
    nodes_per_graph = 8
    num_graphs = 2
    n = nodes_per_graph * num_graphs

    x = jax.random.normal(kx, (n, 2), jnp.float32)

    srcs, dsts = [], []
    for g in range(num_graphs):
        base = g * nodes_per_graph
        for i in range(nodes_per_graph):
            a = base + i
            b = base + (i + 1) % nodes_per_graph
            srcs += [a, b]
            dsts += [b, a]
    edge_index = jnp.array([srcs, dsts], dtype=jnp.int32)   # [2, 32]
    batch = jnp.repeat(jnp.arange(num_graphs, dtype=jnp.int32), nodes_per_graph)

    params = init_params(kp)

    out = gcn_forward(x, edge_index, batch, params, num_graphs)
    out = jax.block_until_ready(out)

    assert out.shape == (num_graphs, NUM_CLASSES)
    # log_softmax rows must exponentiate-sum to 1
    assert jnp.allclose(jnp.sum(jnp.exp(out), axis=1), 1.0, atol=1e-4)
    # match the pure-JAX f32 reference (bf16 operand tolerance)
    ref = gcn_reference(x, edge_index, batch, params, num_graphs)
    assert jnp.allclose(out, ref, atol=1e-1, rtol=1e-1)
    print("KERNEL_OK")
</pallas_src>

<mosaic_0001>
module attributes {stable_mosaic.version = 11 : i64} {
  func.func @gcn_main_kernel(%arg0: i32, %arg1: i32, %arg2: memref<256x256xbf16, #tpu.memory_space<vmem>>, %arg3: memref<256x128xbf16, #tpu.memory_space<vmem>>, %arg4: memref<8x256xbf16, #tpu.memory_space<vmem>>, %arg5: memref<128x64xbf16, #tpu.memory_space<vmem>>, %arg6: memref<1x64xf32, #tpu.memory_space<vmem>>, %arg7: memref<64x128xbf16, #tpu.memory_space<vmem>>, %arg8: memref<1x8x128xf32, #tpu.memory_space<vmem>>, %arg9: memref<256x128xf32, #tpu.memory_space<vmem>>) attributes {dimension_semantics = [#tpu.dimension_semantics<parallel>, #tpu.dimension_semantics<arbitrary>], iteration_bounds = array<i64: 1, 1>, scalar_prefetch = 0 : i64, scratch_operands = 1 : i64, tpu.core_type = #tpu.core_type<tc>, window_params = [{transform_indices = @transform_0, window_bounds = array<i64: 256, 256>}, {pipeline_mode = #tpu.pipeline_mode<synchronous>, transform_indices = @transform_1, window_bounds = array<i64: 256, 128>}, {transform_indices = @transform_2, window_bounds = array<i64: 8, 256>}, {pipeline_mode = #tpu.pipeline_mode<synchronous>, transform_indices = @transform_3, window_bounds = array<i64: 128, 64>}, {pipeline_mode = #tpu.pipeline_mode<synchronous>, transform_indices = @transform_4, window_bounds = array<i64: 1, 64>}, {pipeline_mode = #tpu.pipeline_mode<synchronous>, transform_indices = @transform_5, window_bounds = array<i64: 64, 128>}, {transform_indices = @transform_6, window_bounds = array<i64: 1, 8, 128>}]} {
    %c0_i32 = arith.constant 0 : i32
    %0 = arith.cmpi eq, %arg1, %c0_i32 : i32
    %1 = arith.extui %0 : i1 to i32
    %c0_i32_0 = arith.constant 0 : i32
    %2 = arith.cmpi ne, %1, %c0_i32_0 : i32
    scf.if %2 {
      %cst_9 = arith.constant 0.000000e+00 : f32
      %15 = vector.broadcast %cst_9 : f32 to vector<256x128xf32>
      %c0_10 = arith.constant 0 : index
      %c0_11 = arith.constant 0 : index
      %16 = vector.load %arg9[%c0_10, %c0_11] : memref<256x128xf32, #tpu.memory_space<vmem>>, vector<256x128xf32>
      tpu.vector_store %arg9[%c0_10, %c0_11], %15 {strides = array<i32>} : memref<256x128xf32, #tpu.memory_space<vmem>>, vector<256x128xf32>,
    } else {
    }
    %c256_i32 = arith.constant 256 : i32
    %3 = arith.muli %arg1, %c256_i32 : i32
    %4 = tpu.assume_multiple %3, 256 : i32
    %5 = arith.index_cast %4 : i32 to index
    %c0 = arith.constant 0 : index
    %6 = vector.load %arg3[%5, %c0] : memref<256x128xbf16, #tpu.memory_space<vmem>>, vector<256x128xbf16>
    %c0_1 = arith.constant 0 : index
    %c0_2 = arith.constant 0 : index
    %7 = vector.load %arg9[%c0_1, %c0_2] : memref<256x128xf32, #tpu.memory_space<vmem>>, vector<256x128xf32>
    %c0_3 = arith.constant 0 : index
    %c0_4 = arith.constant 0 : index
    %8 = vector.load %arg2[%c0_3, %c0_4] : memref<256x256xbf16, #tpu.memory_space<vmem>>, vector<256x256xbf16>
    %cst = arith.constant dense<0.000000e+00> : vector<256x128xf32>
    %9 = tpu.matmul %8, %6, %cst {dimension_numbers = #tpu.dot_dimension_numbers<[1], [0], [0], [1], [0, 0, 1, 1], [], []>} : vector<256x256xbf16>, vector<256x128xbf16>, vector<256x128xf32> -> vector<256x128xf32>
    %10 = arith.addf %7, %9 : vector<256x128xf32>
    %c0_5 = arith.constant 0 : index
    %c0_6 = arith.constant 0 : index
    %11 = vector.load %arg9[%c0_5, %c0_6] : memref<256x128xf32, #tpu.memory_space<vmem>>, vector<256x128xf32>
    tpu.vector_store %arg9[%c0_5, %c0_6], %10 {strides = array<i32>} : memref<256x128xf32, #tpu.memory_space<vmem>>, vector<256x128xf32>,
    %c0_i32_7 = arith.constant 0 : i32
    %12 = arith.cmpi eq, %arg1, %c0_i32_7 : i32
    %13 = arith.extui %12 : i1 to i32
    %c0_i32_8 = arith.constant 0 : i32
    %14 = arith.cmpi ne, %13, %c0_i32_8 : i32
    scf.if %14 {
      %c0_9 = arith.constant 0 : index
      %c0_10 = arith.constant 0 : index
      %15 = vector.load %arg9[%c0_9, %c0_10] : memref<256x128xf32, #tpu.memory_space<vmem>>, vector<256x128xf32>
      %16 = arith.truncf %15 : vector<256x128xf32> to vector<256x128xbf16>
      %c0_11 = arith.constant 0 : index
      %c0_12 = arith.constant 0 : index
      %17 = vector.load %arg5[%c0_11, %c0_12] : memref<128x64xbf16, #tpu.memory_space<vmem>>, vector<128x64xbf16>
      %cst_13 = arith.constant dense<0.000000e+00> : vector<256x64xf32>
      %18 = tpu.matmul %16, %17, %cst_13 {dimension_numbers = #tpu.dot_dimension_numbers<[1], [0], [0], [1], [0, 0, 1, 1], [], []>} : vector<256x128xbf16>, vector<128x64xbf16>, vector<256x64xf32> -> vector<256x64xf32>
      %c0_14 = arith.constant 0 : index
      %c0_15 = arith.constant 0 : index
      %19 = vector.load %arg6[%c0_14, %c0_15] : memref<1x64xf32, #tpu.memory_space<vmem>>, vector<1x64xf32>
      %20 = vector.broadcast %19 : vector<1x64xf32> to vector<256x64xf32>
      %21 = arith.addf %18, %20 : vector<256x64xf32>
      %cst_16 = arith.constant 0.000000e+00 : f32
      %22 = vector.broadcast %cst_16 : f32 to vector<256x64xf32>
      %23 = arith.maximumf %21, %22 : vector<256x64xf32>
      %24 = arith.truncf %23 : vector<256x64xf32> to vector<256x64xbf16>
      %c0_17 = arith.constant 0 : index
      %c0_18 = arith.constant 0 : index
      %25 = vector.load %arg7[%c0_17, %c0_18] : memref<64x128xbf16, #tpu.memory_space<vmem>>, vector<64x128xbf16>
      %cst_19 = arith.constant dense<0.000000e+00> : vector<256x128xf32>
      %26 = tpu.matmul %24, %25, %cst_19 {dimension_numbers = #tpu.dot_dimension_numbers<[1], [0], [0], [1], [0, 0, 1, 1], [], []>} : vector<256x64xbf16>, vector<64x128xbf16>, vector<256x128xf32> -> vector<256x128xf32>
      %c0_20 = arith.constant 0 : index
      %c0_21 = arith.constant 0 : index
      %27 = vector.load %arg4[%c0_20, %c0_21] : memref<8x256xbf16, #tpu.memory_space<vmem>>, vector<8x256xbf16>
      %28 = arith.truncf %26 : vector<256x128xf32> to vector<256x128xbf16>
      %cst_22 = arith.constant dense<0.000000e+00> : vector<8x128xf32>
      %29 = tpu.matmul %27, %28, %cst_22 {dimension_numbers = #tpu.dot_dimension_numbers<[1], [0], [0], [1], [0, 0, 1, 1], [], []>} : vector<8x256xbf16>, vector<256x128xbf16>, vector<8x128xf32> -> vector<8x128xf32>
      %c0_23 = arith.constant 0 : index
      %c0_24 = arith.constant 0 : index
      %c0_25 = arith.constant 0 : index
      %30 = vector.load %arg8[%c0_23, %c0_24, %c0_25] : memref<1x8x128xf32, #tpu.memory_space<vmem>>, vector<1x8x128xf32>
      %31 = vector.shape_cast %30 : vector<1x8x128xf32> to vector<8x128xf32>
      %32 = vector.shape_cast %29 : vector<8x128xf32> to vector<1x8x128xf32>
      tpu.vector_store %arg8[%c0_23, %c0_24, %c0_25], %32 {strides = array<i32>} : memref<1x8x128xf32, #tpu.memory_space<vmem>>, vector<1x8x128xf32>,
    } else {
    }
    return
  }
  func.func @transform_0(%arg0: i32, %arg1: i32) -> (i32, i32) {
    %c0_i32 = arith.constant 0 : i32
    return %arg0, %arg1 : i32, i32
  }
  func.func @transform_1(%arg0: i32, %arg1: i32) -> (i32, i32) {
    %c0_i32 = arith.constant 0 : i32
    %c0_i32_0 = arith.constant 0 : i32
    %c0_i32_1 = arith.constant 0 : i32
    return %c0_i32, %c0_i32_0 : i32, i32
  }
  func.func @transform_2(%arg0: i32, %arg1: i32) -> (i32, i32) {
    %c0_i32 = arith.constant 0 : i32
    %c0_i32_0 = arith.constant 0 : i32
    return %c0_i32, %arg0 : i32, i32
  }
  func.func @transform_3(%arg0: i32, %arg1: i32) -> (i32, i32) {
    %c0_i32 = arith.constant 0 : i32
    %c0_i32_0 = arith.constant 0 : i32
    %c0_i32_1 = arith.constant 0 : i32
    return %c0_i32, %c0_i32_0 : i32, i32
  }
  func.func @transform_4(%arg0: i32, %arg1: i32) -> (i32, i32) {
    %c0_i32 = arith.constant 0 : i32
    %c0_i32_0 = arith.constant 0 : i32
    %c0_i32_1 = arith.constant 0 : i32
    return %c0_i32, %c0_i32_0 : i32, i32
  }
  func.func @transform_5(%arg0: i32, %arg1: i32) -> (i32, i32) {
    %c0_i32 = arith.constant 0 : i32
    %c0_i32_0 = arith.constant 0 : i32
    %c0_i32_1 = arith.constant 0 : i32
    return %c0_i32, %c0_i32_0 : i32, i32
  }
  func.func @transform_6(%arg0: i32, %arg1: i32) -> (i32, i32, i32) {
    %c0_i32 = arith.constant 0 : i32
    %c0_i32_0 = arith.constant 0 : i32
    %c0_i32_1 = arith.constant 0 : i32
    return %arg0, %c0_i32, %c0_i32_0 : i32, i32, i32
  }
}

</mosaic_0001>

<bundles_post_ra>
// kernel: tpu_custom_call.1
= control target key start
LH: loop header
LB: loop body
LE: loop exit
PB: predicated region body
PF: predicated region fallthrough
CT: control target
= control target key end

     0   :  { %11 = vsyncpa [#allocation4], 0  ;;  %s1975_s0 = inlined_call_operand.hbm [shape: bf16[256,256], index: 0, kind: input, shape index: {}]   ;;  %s1976_s1 = inlined_call_operand.hbm [shape: bf16[256,128], index: 1, kind: input, shape index: {}]   ;;  %s1977_s2 = inlined_call_operand.vmem [shape: bf16[8,256], index: 2, kind: input, shape index: {}]   ;;  %s1978_s3 = inlined_call_operand.vmem [shape: bf16[128,64], index: 3, kind: input, shape index: {}]   ;;  %s1979_s4 = inlined_call_operand.vmem [shape: f32[1,64], index: 4, kind: input, shape index: {}]   ;;  %s1980_s5 = inlined_call_operand.vmem [shape: bf16[64,128], index: 5, kind: input, shape index: {}]   ;;  %s1981_s6 = inlined_call_operand.hbm [shape: f32[1,8,128], index: 6, kind: output, shape index: {}]  }
   0x1   :  { %12 = vsyncpa [#allocation7], 0 }
   0x2   :  { %13 = vsyncpa [#allocation5], 0  ;;  %s1823_s21 = smov [#allocation3]  }
   0x3   :  { %s19_s22 = sshll.u32 %s1823_s21, 4  ;;  %s20_s22 = int_to_ptr.vmem [resolvable:$true] %s19_s22 }
   0x4   :  { %s1765_s23 = scalar_lea.vmem %s20_s22, 4096  ;;  %p1770_p1 = scmp.lt.s32.totalorder %s20_s22, %s20_s22 }
   0x5   :  { %p1766_p0 = scmp.ne.s32.totalorder %s20_s22, %s1765_s23  ;;  %p1771_p2 = scmp.lt.s32.totalorder %s1765_s23, %s1765_s23 }
   0x7   :  { %p1772_p3 = por %p1771_p2, %p1770_p1 }
   0x9   :  { %p1773_p4 = pnand %p1772_p3, %p1766_p0 }
   0xb   :  { %1776 = shalt.err (!%p1773_p4)
}
   0xc   :  { %s1824_s24 = smov 128   ;;  %s1825_s25 = smov 8  }
   0xd   :  { %25 = dma.hbm_to_vmem [thread:$0]  %s1975_s0, 4096, %s20_s22, [#allocation4], %s1824_s24, %s1824_s24, %s1825_s25  }
   0xe   :  { %s1826_s28 = smov [#allocation6]  }
   0xf   :  { %s31_s29 = sshll.u32 %s1826_s28, 4  ;;  %s32_s29 = int_to_ptr.vmem [resolvable:$true] %s31_s29 }
  0x10   :  { %s1785_s30 = scalar_lea.vmem %s32_s29, 2048  ;;  %p1790_p6 = scmp.lt.s32.totalorder %s32_s29, %s32_s29 }
  0x11   :  { %p1786_p5 = scmp.ne.s32.totalorder %s32_s29, %s1785_s30  ;;  %p1791_p7 = scmp.lt.s32.totalorder %s1785_s30, %s1785_s30 }
  0x13   :  { %p1792_p8 = por %p1791_p7, %p1790_p6 }
  0x15   :  { %p1793_p9 = pnand %p1792_p8, %p1786_p5 }
  0x17   :  { %1796 = shalt.err (!%p1793_p9)
}
  0x18   :  { %s1827_s7 = smov 64   ;;  %s1828_s8 = smov 4  }
  0x19   :  { %37 = dma.hbm_to_vmem [thread:$0]  %s1976_s1, 2048, %s32_s29, [#allocation7], %s1827_s7, %s1827_s7, %s1828_s8  }
  0x1a   :  { %1817 = dma.done.wait [#allocation4], 4096  }
  0x1b   :  { %1818 = vsyncadd [#allocation4], 4294963200 }
  0x1c   :  { %1819 = dma.done.wait [#allocation7], 2048  }
  0x1d   :  { %1820 = vsyncadd [#allocation7], 4294965248  ;;  %v1679_v0 = vld [vmem:[#allocation6 + $0x78] sm:$0xff]   ;;  %v1681_v2 = vld [vmem:[#allocation6 + $0x70] sm:$0xff]   ;;  %vm1034_vm0 = vcmask 523264  }
  0x1e   :  { %v1680_v1 = vld [vmem:[#allocation6 + $0x38] sm:$0xff]   ;;  %1406 = vmatprep.subr.bf16.mxu0 %v1679_v0  ;;  %v1682_v3 = vld [vmem:[#allocation6 + $0x30] sm:$0xff]   ;;  %v1683_v4 = vld [vmem:[#allocation6 + $0x68] sm:$0xff]  }
  0x1f   :  { %1407 = vmatpush3.bf16.msra.mxu0 %v1680_v1  ;;  %v1684_v5 = vld [vmem:[#allocation6 + $0x28] sm:$0xff]   ;;  %v1685_v6 = vld [vmem:[#allocation6 + $0x60] sm:$0xff]   ;;  %v1687_v8 = vld [vmem:[#allocation6 + $0x58] sm:$0xff]  }
  0x20   :  { %1408 = vmatprep.subr.bf16.mxu0 %v1681_v2  ;;  %v1686_v7 = vld [vmem:[#allocation6 + $0x20] sm:$0xff]   ;;  %v1688_v9 = vld [vmem:[#allocation6 + $0x18] sm:$0xff]   ;;  %v1689_v10 = vld [vmem:[#allocation6 + $0x50] sm:$0xff]  }
  0x21   :  { %v1697_v11 = vld [vmem:[#allocation3 + $0x4] ss:$8 sps:$4 sm:$0xff]   ;;  %v1690_v12 = vld [vmem:[#allocation6 + $0x10] sm:$0xff]   ;;  %v1695_v17 = vld [vmem:[#allocation3] ss:$8 sps:$4 sm:$0xff]  }
  0x22   :  { %478 = vmatprep.mubr.bf16.mxu0 %v1697_v11  ;;  %v1691_v13 = vld [vmem:[#allocation6 + $0x48] sm:$0xff]   ;;  %v1693_v15 = vld [vmem:[#allocation6 + $0x40] sm:$0xff]   ;;  %v1698_v18 = vld [vmem:[#allocation3 + $0x14] ss:$8 sps:$4 sm:$0xff]  }
  0x23   :  { %1409 = vmatpush3.bf16.msra.mxu0 %v1682_v3  ;;  %v1692_v14 = vld [vmem:[#allocation6 + $0x8] sm:$0xff]   ;;  %v1694_v16 = vld [vmem:[#allocation6] sm:$0xff]   ;;  %v1700_v19 = vld [vmem:[#allocation3 + $0x10] ss:$8 sps:$4 sm:$0xff]  }
  0x24   :  { %1410 = vmatprep.subr.bf16.mxu0 %v1683_v4  ;;  %v1701_v20 = vld [vmem:[#allocation3 + $0x24] ss:$8 sps:$4 sm:$0xff]   ;;  %v1743_v21 = vld [vmem:[%s1978_s3 + $0x38] sm:$0xff]   ;;  %v1744_v22 = vld [vmem:[%s1978_s3 + $0x30] sm:$0xff]  }
  0x25   :  { %1584 = vmatprep.subr.bf16.mxu1 %v1743_v21  ;;  %v1745_v23 = vld [vmem:[%s1978_s3 + $0x28] sm:$0xff]   ;;  %v1746_v25 = vld [vmem:[%s1978_s3 + $0x20] sm:$0xff]   ;;  %v1704_v26 = vld [vmem:[#allocation3 + $0x34] ss:$8 sps:$4 sm:$0xff]  }
  0x26   :  { %1585 = vmatpush3.bf16.msra.mxu1 %v1743_v21  ;;  %v1703_v24 = vld [vmem:[#allocation3 + $0x20] ss:$8 sps:$4 sm:$0xff]   ;;  %v1706_v27 = vld [vmem:[#allocation3 + $0x30] ss:$8 sps:$4 sm:$0xff]   ;;  %v1707_v28 = vld [vmem:[#allocation3 + $0x44] ss:$8 sps:$4 sm:$0xff]  }
  0x27   :  { %1411 = vmatpush3.bf16.msra.mxu0 %v1684_v5  ;;  %1586 = vmatprep.subr.bf16.mxu1 %v1744_v22  ;;  %v1709_v29 = vld [vmem:[#allocation3 + $0x40] ss:$8 sps:$4 sm:$0xff]   ;;  %v1710_v30 = vld [vmem:[#allocation3 + $0x54] ss:$8 sps:$4 sm:$0xff]   ;;  %v1712_v31 = vld [vmem:[#allocation3 + $0x50] ss:$8 sps:$4 sm:$0xff]  }
  0x28   :  { %1412 = vmatprep.subr.bf16.mxu0 %v1685_v6  ;;  %v1713_v32 = vld [vmem:[#allocation3 + $0x64] ss:$8 sps:$4 sm:$0xff]   ;;  %v1715_v33 = vld [vmem:[#allocation3 + $0x60] ss:$8 sps:$4 sm:$0xff]   ;;  %v1716_v34 = vld [vmem:[#allocation3 + $0x74] ss:$8 sps:$4 sm:$0xff]  }
  0x29   :  { %v1718_v35 = vld [vmem:[#allocation3 + $0x70] ss:$8 sps:$4 sm:$0xff]   ;;  %v1719_v36 = vld [vmem:[#allocation3 + $0x84] ss:$8 sps:$4 sm:$0xff]   ;;  %v1721_v37 = vld [vmem:[#allocation3 + $0x80] ss:$8 sps:$4 sm:$0xff]  }
  0x2a   :  { %1587 = vmatpush3.bf16.msra.mxu1 %v1744_v22  ;;  %v1722_v38 = vld [vmem:[#allocation3 + $0x94] ss:$8 sps:$4 sm:$0xff]   ;;  %v1724_v40 = vld [vmem:[#allocation3 + $0x90] ss:$8 sps:$4 sm:$0xff]   ;;  %v1725_v41 = vld [vmem:[#allocation3 + $0xa4] ss:$8 sps:$4 sm:$0xff]  }
  0x2b   :  { %1413 = vmatpush3.bf16.msra.mxu0 %v1686_v7  ;;  %1588 = vmatprep.subr.bf16.mxu1 %v1745_v23  ;;  %v1747_v39 = vld [vmem:[%s1978_s3 + $0x18] sm:$0xff]   ;;  %v1748_v42 = vld [vmem:[%s1978_s3 + $0x10] sm:$0xff]   ;;  %v1749_v43 = vld [vmem:[%s1978_s3 + $0x8] sm:$0xff]  }
  0x2c   :  { %1414 = vmatprep.subr.bf16.mxu0 %v1687_v8  ;;  %v1727_v44 = vld [vmem:[#allocation3 + $0xa0] ss:$8 sps:$4 sm:$0xff]   ;;  %v1728_v45 = vld [vmem:[#allocation3 + $0xb4] ss:$8 sps:$4 sm:$0xff]   ;;  %v1730_v47 = vld [vmem:[#allocation3 + $0xb0] ss:$8 sps:$4 sm:$0xff]  }
  0x2d   :  { %v1750_v46 = vld [vmem:[%s1978_s3] sm:$0xff]   ;;  %v1734_v50 = vld [vmem:[#allocation3 + $0xd4] ss:$8 sps:$4 sm:$0xff]   ;;  %v1736_v51 = vld [vmem:[#allocation3 + $0xd0] ss:$8 sps:$4 sm:$0xff]  }
  0x2e   :  { %1589 = vmatpush3.bf16.msra.mxu1 %v1745_v23  ;;  %v1731_v48 = vld [vmem:[#allocation3 + $0xc4] ss:$8 sps:$4 sm:$0xff]   ;;  %v1733_v49 = vld [vmem:[#allocation3 + $0xc0] ss:$8 sps:$4 sm:$0xff]   ;;  %v1740_v54 = vld [vmem:[#allocation3 + $0xf4] ss:$8 sps:$4 sm:$0xff]  }
  0x2f   :  { %1415 = vmatpush3.bf16.msra.mxu0 %v1688_v9  ;;  %1590 = vmatprep.subr.bf16.mxu1 %v1746_v25  ;;  %v1737_v52 = vld [vmem:[#allocation3 + $0xe4] ss:$8 sps:$4 sm:$0xff]   ;;  %v1739_v53 = vld [vmem:[#allocation3 + $0xe0] ss:$8 sps:$4 sm:$0xff]   ;;  %v1742_v55 = vld [vmem:[#allocation3 + $0xf0] ss:$8 sps:$4 sm:$0xff]  }
  0x30   :  { %1416 = vmatprep.subr.bf16.mxu0 %v1689_v10  ;;  %v1751_v58 = vld [vmem:[%s1980_s5 + $0x18] sm:$0xff]  }
  0x32   :  { %1591 = vmatpush3.bf16.msra.mxu1 %v1746_v25 }
  0x33   :  { %1417 = vmatpush3.bf16.msra.mxu0 %v1690_v12  ;;  %1592 = vmatprep.subr.bf16.mxu1 %v1747_v39 }
  0x34   :  { %1418 = vmatprep.subr.bf16.mxu0 %v1691_v13 }
  0x36   :  { %1593 = vmatpush3.bf16.msra.mxu1 %v1747_v39 }
  0x37   :  { %1419 = vmatpush3.bf16.msra.mxu0 %v1692_v14  ;;  %1594 = vmatprep.subr.bf16.mxu1 %v1748_v42 }
  0x38   :  { %1420 = vmatprep.subr.bf16.mxu0 %v1693_v15 }
  0x3a   :  { %1595 = vmatpush3.bf16.msra.mxu1 %v1748_v42 }
  0x3b   :  { %1421 = vmatpush3.bf16.msra.mxu0 %v1694_v16  ;;  %1596 = vmatprep.subr.bf16.mxu1 %v1749_v43 }
  0x3e   :  { %479 = vmatmul.mubr.bf16.vlgmr.msra.gmra.mxu0 %v1695_v17  ;;  %1597 = vmatpush3.bf16.msra.mxu1 %v1749_v43 }
  0x3f   :  { %486 = vmatprep.mubr.bf16.mxu0 %v1698_v18  ;;  %1598 = vmatprep.subr.bf16.mxu1 %v1750_v46 }
  0x42   :  { %1599 = vmatpush3.bf16.msra.mxu1 %v1750_v46 }
  0x43   :  { %1632 = vmatprep.subr.bf16.mxu1 %v1751_v58 }
  0x46   :  { %487 = vmatmul.mubr.bf16.gmra.mxu0 %v1700_v19 }
  0x47   :  { %494 = vmatprep.mubr.bf16.mxu0 %v1701_v20 }
  0x4e   :  { %495 = vmatmul.mubr.bf16.gmra.mxu0 %v1703_v24 }
  0x4f   :  { %502 = vmatprep.mubr.bf16.mxu0 %v1704_v26 }
  0x56   :  { %503 = vmatmul.mubr.bf16.gmra.mxu0 %v1706_v27 }
  0x57   :  { %510 = vmatprep.mubr.bf16.mxu0 %v1707_v28 }
  0x5e   :  { %511 = vmatmul.mubr.bf16.gmra.mxu0 %v1709_v29 }
  0x5f   :  { %518 = vmatprep.mubr.bf16.mxu0 %v1710_v30 }
  0x66   :  { %519 = vmatmul.mubr.bf16.gmra.mxu0 %v1712_v31 }
  0x67   :  { %526 = vmatprep.mubr.bf16.mxu0 %v1713_v32 }
  0x6e   :  { %527 = vmatmul.mubr.bf16.gmra.mxu0 %v1715_v33 }
  0x6f   :  { %534 = vmatprep.mubr.bf16.mxu0 %v1716_v34 }
  0x76   :  { %535 = vmatmul.mubr.bf16.gmra.mxu0 %v1718_v35 }
  0x77   :  { %542 = vmatprep.mubr.bf16.mxu0 %v1719_v36 }
  0x7e   :  { %543 = vmatmul.mubr.bf16.gmra.mxu0 %v1721_v37 }
  0x7f   :  { %550 = vmatprep.mubr.bf16.mxu0 %v1722_v38 }
  0x86   :  { %551 = vmatmul.mubr.bf16.gmra.mxu0 %v1724_v40 }
  0x87   :  { %558 = vmatprep.mubr.bf16.mxu0 %v1725_v41 }
  0x8e   :  { %559 = vmatmul.mubr.bf16.gmra.mxu0 %v1727_v44 }
  0x8f   :  { %566 = vmatprep.mubr.bf16.mxu0 %v1728_v45 }
  0x96   :  { %567 = vmatmul.mubr.bf16.gmra.mxu0 %v1730_v47 }
  0x97   :  { %574 = vmatprep.mubr.bf16.mxu0 %v1731_v48 }
  0x9e   :  { %575 = vmatmul.mubr.bf16.gmra.mxu0 %v1733_v49 }
  0x9f   :  { %582 = vmatprep.mubr.bf16.mxu0 %v1734_v50 }
  0xa6   :  { %583 = vmatmul.mubr.bf16.gmra.mxu0 %v1736_v51 }
  0xa7   :  { %590 = vmatprep.mubr.bf16.mxu0 %v1737_v52 }
  0xae   :  { %591 = vmatmul.mubr.bf16.gmra.mxu0 %v1739_v53 }
  0xaf   :  { %598 = vmatprep.mubr.bf16.mxu0 %v1740_v54 }
  0xb6   :  { %599 = vmatmul.mubr.bf16.gmra.mxu0 %v1742_v55 }
  0xfe   :  { %v1422_v56 = vpop.f32.mrf.mxu0 }
 0x100   :  { %v1423_v57 = vpop.f32.mrf.mxu0 }
 0x101   :  { %v1424_v61 = vadd.f32 %v1423_v57, %v1422_v56 }
 0x102   :  { %v1425_v59 = vpop.f32.mrf.mxu0 }
 0x104   :  { %v1426_v60 = vpop.f32.mrf.mxu0 }
 0x105   :  { %v1427_v62 = vadd.f32 %v1426_v60, %v1425_v59 }
 0x106   :  { %v1428_v63 = vpop.f32.mrf.mxu0 }
 0x107   :  { %v706_v0 = vpack.c.bf16 %v1427_v62, %v1424_v61 }
 0x108   :  { %v1429_v1 = vpop.f32.mrf.mxu0 }
 0x109   :  { %1600 = vmatprep.mubr.bf16.mxu1 %v706_v0  ;;  %v1430_v4 = vadd.f32 %v1429_v1, %v1428_v63  ;;  %v1752_v1 = vld [vmem:[%s1980_s5 + $0x10] sm:$0xff]  }
 0x10a   :  { %v1431_v2 = vpop.f32.mrf.mxu0 }
 0x10c   :  { %v1432_v3 = vpop.f32.mrf.mxu0 }
 0x10d   :  { %v1433_v5 = vadd.f32 %v1432_v3, %v1431_v2 }
 0x10e   :  { %v1434_v6 = vpop.f32.mrf.mxu0 }
 0x10f   :  { %v707_v7 = vpack.c.bf16 %v1433_v5, %v1430_v4 }
 0x110   :  { %v1435_v8 = vpop.f32.mrf.mxu0 }
 0x111   :  { %1601 = vmatmul.mubr.bf16.vlgmr.msra.gmra.mxu1 %v707_v7  ;;  %v1436_v11 = vadd.f32 %v1435_v8, %v1434_v6  ;;  %v1753_v6 = vld [vmem:[%s1980_s5 + $0x8] sm:$0xff]  }
 0x112   :  { %v1437_v9 = vpop.f32.mrf.mxu0  ;;  %1633 = vmatpush3.bf16.msra.mxu1 %v1751_v58 }
 0x113   :  { %1634 = vmatprep.subr.bf16.mxu1 %v1752_v1 }
 0x114   :  { %v1438_v10 = vpop.f32.mrf.mxu0 }
 0x115   :  { %v1439_v12 = vadd.f32 %v1438_v10, %v1437_v9  ;;  %v1754_v10 = vld [vmem:[%s1980_s5] sm:$0xff]  }
 0x116   :  { %v1440_v13 = vpop.f32.mrf.mxu0  ;;  %1635 = vmatpush3.bf16.msra.mxu1 %v1752_v1 }
 0x117   :  { %v708_v14 = vpack.c.bf16 %v1439_v12, %v1436_v11  ;;  %1636 = vmatprep.subr.bf16.mxu1 %v1753_v6 }
 0x118   :  { %v1441_v15 = vpop.f32.mrf.mxu0 }
 0x119   :  { %1604 = vmatprep.mubr.bf16.mxu1 %v708_v14  ;;  %v1442_v18 = vadd.f32 %v1441_v15, %v1440_v13 }
 0x11a   :  { %v1443_v16 = vpop.f32.mrf.mxu0  ;;  %1637 = vmatpush3.bf16.msra.mxu1 %v1753_v6 }
 0x11b   :  { %1638 = vmatprep.subr.bf16.mxu1 %v1754_v10 }
 0x11c   :  { %v1444_v17 = vpop.f32.mrf.mxu0 }
 0x11d   :  { %v1445_v19 = vadd.f32 %v1444_v17, %v1443_v16 }
 0x11e   :  { %v1446_v20 = vpop.f32.mrf.mxu0  ;;  %1639 = vmatpush3.bf16.msra.mxu1 %v1754_v10 }
 0x11f   :  { %v709_v21 = vpack.c.bf16 %v1445_v19, %v1442_v18 }
 0x120   :  { %v1447_v22 = vpop.f32.mrf.mxu0 }
 0x121   :  { %1605 = vmatmul.mubr.bf16.gmra.mxu1 %v709_v21  ;;  %v1448_v25 = vadd.f32 %v1447_v22, %v1446_v20 }
 0x122   :  { %v1449_v23 = vpop.f32.mrf.mxu0 }
 0x124   :  { %v1450_v24 = vpop.f32.mrf.mxu0 }
 0x125   :  { %v1451_v26 = vadd.f32 %v1450_v24, %v1449_v23 }
 0x126   :  { %v1452_v27 = vpop.f32.mrf.mxu0 }
 0x127   :  { %v710_v28 = vpack.c.bf16 %v1451_v26, %v1448_v25 }
 0x128   :  { %v1453_v29 = vpop.f32.mrf.mxu0 }
 0x129   :  { %1608 = vmatprep.mubr.bf16.mxu1 %v710_v28  ;;  %v1454_v32 = vadd.f32 %v1453_v29, %v1452_v27 }
 0x12a   :  { %v1455_v30 = vpop.f32.mrf.mxu0 }
 0x12c   :  { %v1456_v31 = vpop.f32.mrf.mxu0 }
 0x12d   :  { %v1457_v33 = vadd.f32 %v1456_v31, %v1455_v30 }
 0x12e   :  { %v1458_v34 = vpop.f32.mrf.mxu0 }
 0x12f   :  { %v711_v35 = vpack.c.bf16 %v1457_v33, %v1454_v32 }
 0x130   :  { %v1459_v36 = vpop.f32.mrf.mxu0 }
 0x131   :  { %1609 = vmatmul.mubr.bf16.gmra.mxu1 %v711_v35  ;;  %v1460_v39 = vadd.f32 %v1459_v36, %v1458_v34 }
 0x132   :  { %v1461_v37 = vpop.f32.mrf.mxu0 }
 0x134   :  { %v1462_v38 = vpop.f32.mrf.mxu0 }
 0x135   :  { %v1463_v40 = vadd.f32 %v1462_v38, %v1461_v37 }
 0x136   :  { %v1464_v41 = vpop.f32.mrf.mxu0 }
 0x137   :  { %v712_v42 = vpack.c.bf16 %v1463_v40, %v1460_v39 }
 0x138   :  { %v1465_v43 = vpop.f32.mrf.mxu0 }
 0x139   :  { %1612 = vmatprep.mubr.bf16.mxu1 %v712_v42  ;;  %v1466_v46 = vadd.f32 %v1465_v43, %v1464_v41 }
 0x13a   :  { %v1467_v44 = vpop.f32.mrf.mxu0 }
 0x13c   :  { %v1468_v45 = vpop.f32.mrf.mxu0 }
 0x13d   :  { %v1469_v47 = vadd.f32 %v1468_v45, %v1467_v44 }
 0x13e   :  { %v1470_v48 = vpop.f32.mrf.mxu0 }
 0x13f   :  { %v713_v49 = vpack.c.bf16 %v1469_v47, %v1466_v46  ;;  %v1910_v46 = vld [vmem:[%s1979_s4] ss:$0 sm:$0xff] }
 0x140   :  { %v1471_v50 = vpop.f32.mrf.mxu0 }
 0x141   :  { %1613 = vmatmul.mubr.bf16.gmra.mxu1 %v713_v49  ;;  %v1472_v53 = vadd.f32 %v1471_v50, %v1470_v48 }
 0x142   :  { %v1473_v51 = vpop.f32.mrf.mxu0 }
 0x144   :  { %v1474_v52 = vpop.f32.mrf.mxu0 }
 0x145   :  { %v1475_v54 = vadd.f32 %v1474_v52, %v1473_v51 }
 0x146   :  { %v1476_v55 = vpop.f32.mrf.mxu0 }
 0x147   :  { %v714_v56 = vpack.c.bf16 %v1475_v54, %v1472_v53 }
 0x148   :  { %v1477_v57 = vpop.f32.mrf.mxu0 }
 0x149   :  { %1616 = vmatprep.mubr.bf16.mxu1 %v714_v56  ;;  %v1478_v60 = vadd.f32 %v1477_v57, %v1476_v55 }
 0x14a   :  { %v1479_v58 = vpop.f32.mrf.mxu0 }
 0x14c   :  { %v1480_v59 = vpop.f32.mrf.mxu0 }
 0x14d   :  { %v1481_v61 = vadd.f32 %v1480_v59, %v1479_v58 }
 0x14e   :  { %v1482_v62 = vpop.f32.mrf.mxu0 }
 0x14f   :  { %v715_v63 = vpack.c.bf16 %v1481_v61, %v1478_v60 }
 0x150   :  { %v1483_v0 = vpop.f32.mrf.mxu0 }
 0x151   :  { %1617 = vmatmul.mubr.bf16.gmra.mxu1 %v715_v63  ;;  %v1484_v4 = vadd.f32 %v1483_v0, %v1482_v62 }
 0x152   :  { %v1485_v2 = vpop.f32.mrf.mxu0 }
 0x154   :  { %v1486_v3 = vpop.f32.mrf.mxu0 }
 0x155   :  { %v1487_v5 = vadd.f32 %v1486_v3, %v1485_v2 }
 0x156   :  { %v1488_v7 = vpop.f32.mrf.mxu0 }
 0x157   :  { %v716_v8 = vpack.c.bf16 %v1487_v5, %v1484_v4 }
 0x158   :  { %v1489_v9 = vpop.f32.mrf.mxu0 }
 0x159   :  { %1620 = vmatprep.mubr.bf16.mxu1 %v716_v8  ;;  %v1490_v13 = vadd.f32 %v1489_v9, %v1488_v7 }
 0x15a   :  { %v1491_v11 = vpop.f32.mrf.mxu0 }
 0x15c   :  { %v1492_v12 = vpop.f32.mrf.mxu0 }
 0x15d   :  { %v1493_v14 = vadd.f32 %v1492_v12, %v1491_v11 }
 0x15e   :  { %v1494_v15 = vpop.f32.mrf.mxu0 }
 0x15f   :  { %v717_v16 = vpack.c.bf16 %v1493_v14, %v1490_v13 }
 0x160   :  { %v1495_v17 = vpop.f32.mrf.mxu0 }
 0x161   :  { %1621 = vmatmul.mubr.bf16.gmra.mxu1 %v717_v16  ;;  %v1496_v20 = vadd.f32 %v1495_v17, %v1494_v15 }
 0x162   :  { %v1497_v18 = vpop.f32.mrf.mxu0 }
 0x164   :  { %v1498_v19 = vpop.f32.mrf.mxu0 }
 0x165   :  { %v1499_v21 = vadd.f32 %v1498_v19, %v1497_v18 }
 0x166   :  { %v1500_v22 = vpop.f32.mrf.mxu0 }
 0x167   :  { %v718_v23 = vpack.c.bf16 %v1499_v21, %v1496_v20 }
 0x168   :  { %v1501_v24 = vpop.f32.mrf.mxu0 }
 0x169   :  { %1624 = vmatprep.mubr.bf16.mxu1 %v718_v23  ;;  %v1502_v27 = vadd.f32 %v1501_v24, %v1500_v22 }
 0x16a   :  { %v1503_v25 = vpop.f32.mrf.mxu0 }
 0x16c   :  { %v1504_v26 = vpop.f32.mrf.mxu0 }
 0x16d   :  { %v1505_v28 = vadd.f32 %v1504_v26, %v1503_v25 }
 0x16e   :  { %v1506_v29 = vpop.f32.mrf.mxu0 }
 0x16f   :  { %v719_v30 = vpack.c.bf16 %v1505_v28, %v1502_v27 }
 0x170   :  { %v1507_v31 = vpop.f32.mrf.mxu0 }
 0x171   :  { %1625 = vmatmul.mubr.bf16.gmra.mxu1 %v719_v30  ;;  %v1508_v34 = vadd.f32 %v1507_v31, %v1506_v29 }
 0x172   :  { %v1509_v32 = vpop.f32.mrf.mxu0 }
 0x174   :  { %v1510_v33 = vpop.f32.mrf.mxu0 }
 0x175   :  { %v1511_v35 = vadd.f32 %v1510_v33, %v1509_v32 }
 0x176   :  { %v1512_v36 = vpop.f32.mrf.mxu0 }
 0x177   :  { %v720_v37 = vpack.c.bf16 %v1511_v35, %v1508_v34 }
 0x178   :  { %v1513_v38 = vpop.f32.mrf.mxu0 }
 0x179   :  { %1628 = vmatprep.mubr.bf16.mxu1 %v720_v37  ;;  %v1514_v41 = vadd.f32 %v1513_v38, %v1512_v36 }
 0x17a   :  { %v1515_v39 = vpop.f32.mrf.mxu0 }
 0x17c   :  { %v1516_v40 = vpop.f32.mrf.mxu0 }
 0x17d   :  { %v1517_v42 = vadd.f32 %v1516_v40, %v1515_v39 }
 0x17f   :  { %v721_v43 = vpack.c.bf16 %v1517_v42, %v1514_v41 }
 0x181   :  { %1629 = vmatmul.mubr.bf16.gmra.mxu1 %v721_v43 }
 0x1d1   :  { %v1602_v44 = vpop.f32.mrf.mxu1 }
 0x1d2   :  { %v836_v50 = vadd.f32 %v1602_v44, %v1910_v46 }
 0x1d3   :  { %v827_v45 = vpop.f32.mrf.mxu1 }
 0x1d4   :  { %v828_v48 = vadd.f32 %v1910_v46, %v827_v45  ;;  %v956_v56 = vmax.f32 %v836_v50, 0.0 }
 0x1d5   :  { %v1603_v47 = vpop.f32.mrf.mxu1 }
 0x1d6   :  { %v839_v49 = vadd.f32 %v1603_v47, %v1910_v46  ;;  %v954_v54 = vmax.f32 %v828_v48, 0.0 }
 0x1d7   :  { %v830_v51 = vpop.f32.mrf.mxu1 }
 0x1d8   :  { %v831_v52 = vadd.f32 %v1910_v46, %v830_v51  ;;  %v957_v53 = vmax.f32 %v839_v49, 0.0 }
 0x1da   :  { %v955_v55 = vmax.f32 %v831_v52, 0.0  ;;  %v987_v58 = vpack.c.bf16 %v957_v53, %v956_v56 }
 0x1dc   :  { %v986_v57 = vpack.c.bf16 %v955_v55, %v954_v54 }
 0x1de   :  { %1640 = vmatprep.mubr.msk.bf16.mxu1 %vm1034_vm0, %v986_v57 }
 0x1df   :  { %1641 = vmatmul.mubr.msk.bf16.vlgmr.msra.gmra.mxu1 %vm1034_vm0, %v987_v58 }
 0x1e1   :  { %v1606_v59 = vpop.f32.mrf.mxu1 }
 0x1e2   :  { %v852_v0 = vadd.f32 %v1606_v59, %v1910_v46 }
 0x1e3   :  { %v843_v60 = vpop.f32.mrf.mxu1 }
 0x1e4   :  { %v844_v62 = vadd.f32 %v1910_v46, %v843_v60  ;;  %v960_v6 = vmax.f32 %v852_v0, 0.0 }
 0x1e5   :  { %v1607_v61 = vpop.f32.mrf.mxu1 }
 0x1e6   :  { %v855_v63 = vadd.f32 %v1607_v61, %v1910_v46  ;;  %v958_v4 = vmax.f32 %v844_v62, 0.0 }
 0x1e7   :  { %v846_v1 = vpop.f32.mrf.mxu1 }
 0x1e8   :  { %v847_v2 = vadd.f32 %v1910_v46, %v846_v1  ;;  %v961_v3 = vmax.f32 %v855_v63, 0.0 }
 0x1ea   :  { %v959_v5 = vmax.f32 %v847_v2, 0.0  ;;  %v989_v8 = vpack.c.bf16 %v961_v3, %v960_v6 }
 0x1ec   :  { %v988_v7 = vpack.c.bf16 %v959_v5, %v958_v4 }
 0x1ee   :  { %1644 = vmatprep.mubr.msk.bf16.mxu1 %vm1034_vm0, %v988_v7 }
 0x1ef   :  { %1645 = vmatmul.mubr.msk.bf16.gmra.mxu1 %vm1034_vm0, %v989_v8 }
 0x1f1   :  { %v1610_v9 = vpop.f32.mrf.mxu1 }
 0x1f2   :  { %v868_v14 = vadd.f32 %v1610_v9, %v1910_v46 }
 0x1f3   :  { %v859_v10 = vpop.f32.mrf.mxu1 }
 0x1f4   :  { %v860_v12 = vadd.f32 %v1910_v46, %v859_v10  ;;  %v964_v20 = vmax.f32 %v868_v14, 0.0 }
 0x1f5   :  { %v1611_v11 = vpop.f32.mrf.mxu1 }
 0x1f6   :  { %v871_v13 = vadd.f32 %v1611_v11, %v1910_v46  ;;  %v962_v18 = vmax.f32 %v860_v12, 0.0 }
 0x1f7   :  { %v862_v15 = vpop.f32.mrf.mxu1 }
 0x1f8   :  { %v863_v16 = vadd.f32 %v1910_v46, %v862_v15  ;;  %v965_v17 = vmax.f32 %v871_v13, 0.0 }
 0x1fa   :  { %v963_v19 = vmax.f32 %v863_v16, 0.0  ;;  %v991_v22 = vpack.c.bf16 %v965_v17, %v964_v20 }
 0x1fc   :  { %v990_v21 = vpack.c.bf16 %v963_v19, %v962_v18 }
 0x1fe   :  { %1648 = vmatprep.mubr.msk.bf16.mxu1 %vm1034_vm0, %v990_v21 }
 0x1ff   :  { %1649 = vmatmul.mubr.msk.bf16.gmra.mxu1 %vm1034_vm0, %v991_v22 }
 0x201   :  { %v1614_v23 = vpop.f32.mrf.mxu1 }
 0x202   :  { %v884_v28 = vadd.f32 %v1614_v23, %v1910_v46 }
 0x203   :  { %v875_v24 = vpop.f32.mrf.mxu1 }
 0x204   :  { %v876_v26 = vadd.f32 %v1910_v46, %v875_v24  ;;  %v968_v34 = vmax.f32 %v884_v28, 0.0 }
 0x205   :  { %v1615_v25 = vpop.f32.mrf.mxu1 }
 0x206   :  { %v887_v27 = vadd.f32 %v1615_v25, %v1910_v46  ;;  %v966_v32 = vmax.f32 %v876_v26, 0.0 }
 0x207   :  { %v878_v29 = vpop.f32.mrf.mxu1 }
 0x208   :  { %v879_v30 = vadd.f32 %v1910_v46, %v878_v29  ;;  %v969_v31 = vmax.f32 %v887_v27, 0.0 }
 0x20a   :  { %v967_v33 = vmax.f32 %v879_v30, 0.0  ;;  %v993_v36 = vpack.c.bf16 %v969_v31, %v968_v34 }
 0x20c   :  { %v992_v35 = vpack.c.bf16 %v967_v33, %v966_v32 }
 0x20e   :  { %1652 = vmatprep.mubr.msk.bf16.mxu1 %vm1034_vm0, %v992_v35 }
 0x20f   :  { %1653 = vmatmul.mubr.msk.bf16.gmra.mxu1 %vm1034_vm0, %v993_v36 }
 0x211   :  { %v1618_v37 = vpop.f32.mrf.mxu1 }
 0x212   :  { %v900_v42 = vadd.f32 %v1618_v37, %v1910_v46  ;;  %v1244_v37 = vld [vmem:[%s1977_s2] sm:$0xff]  ;;  %s1829_s2 = smov [#allocation8]  }
 0x213   :  { %v891_v38 = vpop.f32.mrf.mxu1  ;;  %s1315_s10 = sshll.u32 %s1829_s2, 4  ;;  %s1316_s10 = int_to_ptr.vmem [resolvable:$true] %s1315_s10 }
 0x214   :  { %v892_v40 = vadd.f32 %v1910_v46, %v891_v38  ;;  %v972_v49 = vmax.f32 %v900_v42, 0.0  ;;  %s1797_s0 = scalar_lea.vmem %s1316_s10, 128  ;;  %p1802_p11 = scmp.lt.s32.totalorder %s1316_s10, %s1316_s10 }
 0x215   :  { %v1619_v39 = vpop.f32.mrf.mxu1  ;;  %p1798_p10 = scmp.ne.s32.totalorder %s1316_s10, %s1797_s0  ;;  %p1803_p12 = scmp.lt.s32.totalorder %s1797_s0, %s1797_s0 }
 0x216   :  { %v903_v41 = vadd.f32 %v1619_v39, %v1910_v46  ;;  %v970_v47 = vmax.f32 %v892_v40, 0.0  ;;  %v1405_v39 = vcombine.high %v1244_v37, %v1244_v37 }
 0x217   :  { %v894_v43 = vpop.f32.mrf.mxu1  ;;  %p1804_p13 = por %p1803_p12, %p1802_p11 }
 0x218   :  { %v895_v44 = vadd.f32 %v1910_v46, %v894_v43  ;;  %v973_v45 = vmax.f32 %v903_v41, 0.0  ;;  %1300 = vmatprep.mubr.bf16.mxu0 %v1405_v39 }
 0x219   :  { %p1805_p0 = pnand %p1804_p13, %p1798_p10 }
 0x21a   :  { %v971_v48 = vmax.f32 %v895_v44, 0.0  ;;  %v995_v51 = vpack.c.bf16 %v973_v45, %v972_v49 }
 0x21c   :  { %v994_v50 = vpack.c.bf16 %v971_v48, %v970_v47 }
 0x21e   :  { %1656 = vmatprep.mubr.msk.bf16.mxu1 %vm1034_vm0, %v994_v50 }
 0x21f   :  { %1657 = vmatmul.mubr.msk.bf16.gmra.mxu1 %vm1034_vm0, %v995_v51 }
 0x221   :  { %v1622_v52 = vpop.f32.mrf.mxu1 }
 0x222   :  { %v916_v57 = vadd.f32 %v1622_v52, %v1910_v46 }
 0x223   :  { %v907_v53 = vpop.f32.mrf.mxu1 }
 0x224   :  { %v908_v55 = vadd.f32 %v1910_v46, %v907_v53  ;;  %v976_v63 = vmax.f32 %v916_v57, 0.0 }
 0x225   :  { %v1623_v54 = vpop.f32.mrf.mxu1 }
 0x226   :  { %v919_v56 = vadd.f32 %v1623_v54, %v1910_v46  ;;  %v974_v61 = vmax.f32 %v908_v55, 0.0 }
 0x227   :  { %v910_v58 = vpop.f32.mrf.mxu1 }
 0x228   :  { %v911_v59 = vadd.f32 %v1910_v46, %v910_v58  ;;  %v977_v60 = vmax.f32 %v919_v56, 0.0 }
 0x22a   :  { %v975_v62 = vmax.f32 %v911_v59, 0.0  ;;  %v997_v1 = vpack.c.bf16 %v977_v60, %v976_v63 }
 0x22c   :  { %v996_v0 = vpack.c.bf16 %v975_v62, %v974_v61 }
 0x22e   :  { %1660 = vmatprep.mubr.msk.bf16.mxu1 %vm1034_vm0, %v996_v0 }
 0x22f   :  { %1661 = vmatmul.mubr.msk.bf16.gmra.mxu1 %vm1034_vm0, %v997_v1 }
 0x231   :  { %v1626_v2 = vpop.f32.mrf.mxu1 }
 0x232   :  { %v932_v7 = vadd.f32 %v1626_v2, %v1910_v46 }
 0x233   :  { %v923_v3 = vpop.f32.mrf.mxu1 }
 0x234   :  { %v924_v5 = vadd.f32 %v1910_v46, %v923_v3  ;;  %v980_v13 = vmax.f32 %v932_v7, 0.0 }
 0x235   :  { %v1627_v4 = vpop.f32.mrf.mxu1 }
 0x236   :  { %v935_v6 = vadd.f32 %v1627_v4, %v1910_v46  ;;  %v978_v11 = vmax.f32 %v924_v5, 0.0 }
 0x237   :  { %v926_v8 = vpop.f32.mrf.mxu1 }
 0x238   :  { %v927_v9 = vadd.f32 %v1910_v46, %v926_v8  ;;  %v981_v10 = vmax.f32 %v935_v6, 0.0 }
 0x23a   :  { %v979_v12 = vmax.f32 %v927_v9, 0.0  ;;  %v999_v15 = vpack.c.bf16 %v981_v10, %v980_v13 }
 0x23c   :  { %v998_v14 = vpack.c.bf16 %v979_v12, %v978_v11 }
 0x23e   :  { %1664 = vmatprep.mubr.msk.bf16.mxu1 %vm1034_vm0, %v998_v14 }
 0x23f   :  { %1665 = vmatmul.mubr.msk.bf16.gmra.mxu1 %vm1034_vm0, %v999_v15 }
 0x241   :  { %v1630_v16 = vpop.f32.mrf.mxu1 }
 0x242   :  { %v948_v21 = vadd.f32 %v1630_v16, %v1910_v46  ;;  %v1404_v16 = vcombine.low %v1244_v37, %v1244_v37 }
 0x243   :  { %v939_v17 = vpop.f32.mrf.mxu1 }
 0x244   :  { %v940_v19 = vadd.f32 %v1910_v46, %v939_v17  ;;  %v984_v27 = vmax.f32 %v948_v21, 0.0 }
 0x245   :  { %v1631_v18 = vpop.f32.mrf.mxu1 }
 0x246   :  { %v951_v20 = vadd.f32 %v1631_v18, %v1910_v46  ;;  %v982_v25 = vmax.f32 %v940_v19, 0.0 }
 0x247   :  { %v942_v22 = vpop.f32.mrf.mxu1 }
 0x248   :  { %v943_v23 = vadd.f32 %v1910_v46, %v942_v22  ;;  %v985_v24 = vmax.f32 %v951_v20, 0.0 }
 0x24a   :  { %v983_v26 = vmax.f32 %v943_v23, 0.0  ;;  %v1001_v29 = vpack.c.bf16 %v985_v24, %v984_v27 }
 0x24c   :  { %v1000_v28 = vpack.c.bf16 %v983_v26, %v982_v25 }
 0x24e   :  { %1668 = vmatprep.mubr.msk.bf16.mxu1 %vm1034_vm0, %v1000_v28 }
 0x24f   :  { %1669 = vmatmul.mubr.msk.bf16.gmra.mxu1 %vm1034_vm0, %v1001_v29 }
 0x29f   :  { %v1960_v30 = vpop.f32.mrf.mxu1 }
 0x2a1   :  { %v1962_v31 = vpop.f32.mrf.mxu1 }
 0x2a3   :  { %v1643_v32 = vpop.f32.mrf.mxu1 }
 0x2a4   :  { %v1246_v33 = vpack.c.bf16 %v1643_v32, %v1960_v30 }
 0x2a5   :  { %v1965_v34 = vpop.f32.mrf.mxu1 }
 0x2a6   :  { %v1245_v46 = vpack.c.bf16 %v1965_v34, %v1962_v31 }
 0x2af   :  { %v1646_v35 = vpop.f32.mrf.mxu1 }
 0x2b1   :  { %v1133_v36 = vpop.f32.mrf.mxu1 }
 0x2b3   :  { %v1647_v38 = vpop.f32.mrf.mxu1 }
 0x2b4   :  { %v1248_v40 = vpack.c.bf16 %v1647_v38, %v1646_v35 }
 0x2b5   :  { %v1136_v41 = vpop.f32.mrf.mxu1 }
 0x2b6   :  { %v1247_v42 = vpack.c.bf16 %v1136_v41, %v1133_v36 }
 0x2bf   :  { %v1650_v43 = vpop.f32.mrf.mxu1 }
 0x2c1   :  { %v1149_v44 = vpop.f32.mrf.mxu1 }
 0x2c3   :  { %v1651_v45 = vpop.f32.mrf.mxu1 }
 0x2c4   :  { %v1250_v9 = vpack.c.bf16 %v1651_v45, %v1650_v43 }
 0x2c5   :  { %v1152_v47 = vpop.f32.mrf.mxu1 }
 0x2c6   :  { %v1249_v11 = vpack.c.bf16 %v1152_v47, %v1149_v44 }
 0x2cf   :  { %v1654_v48 = vpop.f32.mrf.mxu1 }
 0x2d1   :  { %v1165_v49 = vpop.f32.mrf.mxu1 }
 0x2d3   :  { %v1655_v50 = vpop.f32.mrf.mxu1 }
 0x2d4   :  { %v1252_v4 = vpack.c.bf16 %v1655_v50, %v1654_v48 }
 0x2d5   :  { %v1168_v51 = vpop.f32.mrf.mxu1 }
 0x2d6   :  { %v1251_v7 = vpack.c.bf16 %v1168_v51, %v1165_v49 }
 0x2df   :  { %v1658_v52 = vpop.f32.mrf.mxu1 }
 0x2e1   :  { %v1181_v53 = vpop.f32.mrf.mxu1 }
 0x2e3   :  { %v1659_v54 = vpop.f32.mrf.mxu1 }
 0x2e4   :  { %v1254_v14 = vpack.c.bf16 %v1659_v54, %v1658_v52 }
 0x2e5   :  { %v1184_v55 = vpop.f32.mrf.mxu1 }
 0x2e6   :  { %v1253_v15 = vpack.c.bf16 %v1184_v55, %v1181_v53 }
 0x2ef   :  { %v1662_v56 = vpop.f32.mrf.mxu1 }
 0x2f1   :  { %v1197_v57 = vpop.f32.mrf.mxu1 }
 0x2f3   :  { %v1663_v58 = vpop.f32.mrf.mxu1 }
 0x2f4   :  { %v1256_v12 = vpack.c.bf16 %v1663_v58, %v1662_v56 }
 0x2f5   :  { %v1200_v59 = vpop.f32.mrf.mxu1 }
 0x2f6   :  { %v1255_v13 = vpack.c.bf16 %v1200_v59, %v1197_v57 }
 0x2ff   :  { %v1666_v60 = vpop.f32.mrf.mxu1 }
 0x301   :  { %v1213_v61 = vpop.f32.mrf.mxu1 }
 0x303   :  { %v1667_v62 = vpop.f32.mrf.mxu1 }
 0x304   :  { %v1258_v8 = vpack.c.bf16 %v1667_v62, %v1666_v60 }
 0x305   :  { %v1216_v63 = vpop.f32.mrf.mxu1 }
 0x306   :  { %v1257_v10 = vpack.c.bf16 %v1216_v63, %v1213_v61 }
 0x30f   :  { %v1670_v0 = vpop.f32.mrf.mxu1 }
 0x311   :  { %v1229_v1 = vpop.f32.mrf.mxu1 }
 0x313   :  { %v1671_v2 = vpop.f32.mrf.mxu1 }
 0x314   :  { %v1260_v3 = vpack.c.bf16 %v1671_v2, %v1670_v0 }
 0x315   :  { %v1232_v5 = vpop.f32.mrf.mxu1 }
 0x316   :  { %v1259_v6 = vpack.c.bf16 %v1232_v5, %v1229_v1  ;;  %1562 = vmatprep.subr.bf16.mxu0 %v1260_v3 }
 0x317   :  { %1563 = vmatpush3.bf16.msra.mxu0 %v1252_v4 }
 0x318   :  { %1564 = vmatprep.subr.bf16.mxu0 %v1259_v6 }
 0x31b   :  { %1565 = vmatpush3.bf16.msra.mxu0 %v1251_v7 }
 0x31c   :  { %1566 = vmatprep.subr.bf16.mxu0 %v1258_v8 }
 0x31f   :  { %1567 = vmatpush3.bf16.msra.mxu0 %v1250_v9 }
 0x320   :  { %1568 = vmatprep.subr.bf16.mxu0 %v1257_v10 }
 0x323   :  { %1569 = vmatpush3.bf16.msra.mxu0 %v1249_v11 }
 0x324   :  { %1570 = vmatprep.subr.bf16.mxu0 %v1256_v12 }
 0x327   :  { %1571 = vmatpush3.bf16.msra.mxu0 %v1248_v40 }
 0x328   :  { %1572 = vmatprep.subr.bf16.mxu0 %v1255_v13 }
 0x32b   :  { %1573 = vmatpush3.bf16.msra.mxu0 %v1247_v42 }
 0x32c   :  { %1574 = vmatprep.subr.bf16.mxu0 %v1254_v14 }
 0x32f   :  { %1575 = vmatpush3.bf16.msra.mxu0 %v1246_v33 }
 0x330   :  { %1576 = vmatprep.subr.bf16.mxu0 %v1253_v15 }
 0x333   :  { %1577 = vmatpush3.bf16.msra.mxu0 %v1245_v46 }
 0x336   :  { %1301 = vmatmul.mubr.bf16.vlgmr.msra.gmra.mxu0 %v1404_v16 }
 0x3f6   :  { %v1578_v17 = vpop.f32.mrf.mxu0 }
 0x3f8   :  { %v1579_v18 = vpop.f32.mrf.mxu0 }
 0x3f9   :  { %v1580_v19 = vadd.f32 %v1579_v18, %v1578_v17 }
 0x3fa   :  { %v1581_v20 = vpop.f32.mrf.mxu0 }
 0x3fb   :  { %1308 = vst [vmem:[#allocation8] sm:$0xff] %v1580_v19 }
 0x3fc   :  { %v1582_v21 = vpop.f32.mrf.mxu0 }
 0x3fd   :  { %1808 = shalt.err (!%p1805_p0)
}
 0x3fe   :  { %1318 = dma.vmem_to_hbm [thread:$0]  %s1316_s10, 128, %s1981_s6, [#allocation5]  }
 0x3ff   :  { %1821 = dma.done.wait [#allocation5], 128  }
 0x400   :  { %1822 = vsyncadd [#allocation5], 4294967168 }
 0x401   :  { %1322 = vsyncpa [#allocation4], 1 }
 0x402   :  { %1323 = vsyncpa [#allocation7], 1 }
 0x403   :  { %1324 = vsyncpa [#allocation5], 1 }

</bundles_post_ra>
